<compile_context>
chip_gen: v6e
topology: v6e:2x2x1
jax: 0.10.0
libtpu: 0.0.40
codegen_flags: <defaults>
</compile_context>

<pallas_src>
import functools
import re

import jax
import jax.numpy as jnp
from jax.experimental import pallas as pl
from jax.experimental.pallas import tpu as pltpu


def _tpu_generation():
    """Best-effort TPU generation (5, 6, 7, ...) from device_kind; None if unknown."""
    try:
        kind = jax.devices()[0].device_kind.lower()
    except Exception:
        return None
    m = re.search(r"(\d+)", kind)
    return int(m.group(1)) if m else None


def _wmse_kernel(w_ref, yp_ref, yt_ref, out_ref, acc_ref, *,
                 tile_b, num_d_tiles, total_b, inv_n, need_mask):
    """Grid = (cores, steps).  Per step: row-sum of squared diffs (XLU),
    weighted scalar partial accumulated into a (1,1) f32 VMEM scratch.

    w_ref  : (tile_b, 1) per-sample weights for this batch tile
    yp_ref : (tile_b, tile_d) prediction tile
    yt_ref : (tile_b, tile_d) target tile
    out_ref: (1, 1) per-core partial loss in SMEM
    acc_ref: (1, 1) f32 VMEM accumulator (persists across the grid)
    """
    c = pl.program_id(0)
    t = pl.program_id(1)
    n_t = pl.num_programs(1)

    @pl.when(t == 0)
    def _init():
        acc_ref[...] = jnp.zeros_like(acc_ref)

    yp = yp_ref[...]
    yt = yt_ref[...]
    if yp.dtype != jnp.float32:
        yp = yp.astype(jnp.float32)
    if yt.dtype != jnp.float32:
        yt = yt.astype(jnp.float32)
    diff = yp - yt                                              # (tile_b, tile_d)
    rsum = jnp.sum(diff * diff, axis=-1, keepdims=True)         # (tile_b, 1) XLU

    w = w_ref[...]
    if w.dtype != jnp.float32:
        w = w.astype(jnp.float32)
    contrib = rsum * w                                          # (tile_b, 1)

    if need_mask:
        # Zero out rows past the true batch: covers the ragged tail tile and
        # the clamped, replicated tiles of a padded grid (jnp.where also kills
        # any Inf/NaN arising from garbage tail data).
        lt = c * n_t + t                        # un-clamped logical tile index
        bt = lt // num_d_tiles
        row0 = bt * tile_b
        row_ids = row0 + jax.lax.broadcasted_iota(jnp.int32, contrib.shape, 0)
        contrib = jnp.where(row_ids < total_b, contrib, 0.0)

    acc_ref[...] += jnp.sum(contrib, axis=0, keepdims=True)     # (1, 1)

    @pl.when(t == n_t - 1)
    def _fin():
        out_ref[0, 0] = jnp.sum(acc_ref[...]) * inv_n


def weighted_mse_loss(y_pred, y_true, weights, *, tile_b=None):
    """Pallas implementation of WeightedMSELoss.forward.

    y_pred, y_true: (B, D)
    weights:        (B,)   per-sample weights, broadcast over features
    returns:        scalar float32 loss = mean(weights[:,None] * (y_pred-y_true)^2)
    (PyTorch would return the input dtype; float32 is intentional here.)
    """
    B, D = y_pred.shape
    assert y_true.shape == (B, D)
    assert weights.shape == (B,)

    # ---- per-generation DMA target / buffering / VMEM budget -------------
    gen = _tpu_generation()
    if gen is not None and gen >= 7:
        target_tile_bytes = 4 * 1024 * 1024   # 3.2 TB/s: amortize 0.35us step
        data_buffers = 3                      # Buffered(3) on the data inputs
        vmem_budget = 26 * 1024 * 1024        # stay inside 32 MiB default scoped VMEM
    elif gen == 6:
        target_tile_bytes = 4 * 1024 * 1024
        data_buffers = 2
        vmem_budget = 26 * 1024 * 1024
    else:                                     # v5e / v4 / unknown: 16 MiB default
        target_tile_bytes = 2 * 1024 * 1024
        data_buffers = 2
        vmem_budget = 12 * 1024 * 1024

    itemsize = jnp.dtype(y_pred.dtype).itemsize
    row_bytes = D * itemsize

    # ---- batch-tile size: dtype-aware byte target, capped only by VMEM ----
    if tile_b is None:
        tile_b = target_tile_bytes // row_bytes
        # VMEM per row: data (N buffers x 2 inputs) + lane-padded (tile_b,1)
        # weights double-buffer (128 lanes x 4 B each).
        per_row_vmem = data_buffers * 2 * row_bytes + 2 * 128 * 4
        tile_b = min(tile_b, vmem_budget // per_row_vmem)
        tile_b = max(16, (tile_b // 16) * 16)
    tile_b = int(tile_b)
    if tile_b >= B:
        tile_b = B                            # one full-batch tile
    if tile_b != B:
        assert tile_b % 8 == 0, "tile_b must be a multiple of 8 (16 for bf16)"

    num_b_tiles = -(-B // tile_b)

    # ---- optional feature-axis split for tiny-batch / large-D shapes ------
    # Keeps >= ~4 grid steps so pipelining and the 2-way core split engage.
    tile_d = D
    if D % 256 == 0:
        min_chunk_bytes = 512 * 1024
        while (num_b_tiles * (D // tile_d) < 4
               and tile_d % 256 == 0
               and tile_b * (tile_d // 2) * itemsize >= min_chunk_bytes):
            tile_d //= 2
    num_d_tiles = D // tile_d
    total_tiles = num_b_tiles * num_d_tiles

    # ---- 2-way "core" split: only when free, or the chip actually has 2 TCs.
    multi_tc = gen is not None and (gen >= 7 or gen == 4)
    if total_tiles >= 2 and total_tiles % 2 == 0:
        num_cores = 2                         # zero padding -> always harmless
    elif multi_tc and total_tiles >= 9:
        num_cores = 2                         # <= 1/9 padded (masked) re-read
    else:
        num_cores = 1
    steps = -(-total_tiles // num_cores)

    need_mask = (B % tile_b != 0) or (num_cores * steps != total_tiles)
    inv_n = 1.0 / float(B * D)                # mean over ALL elements
    last = total_tiles - 1

    if num_d_tiles == 1:
        def data_map(c, t):
            return (jnp.minimum(c * steps + t, last), 0)
        w_map = data_map
    else:
        def data_map(c, t):
            lt = jnp.minimum(c * steps + t, last)
            return (lt // num_d_tiles, lt % num_d_tiles)

        def w_map(c, t):
            lt = jnp.minimum(c * steps + t, last)
            return (lt // num_d_tiles, 0)

    data_spec = pl.BlockSpec((tile_b, tile_d), data_map)
    if gen is not None and gen >= 7 and hasattr(pl, "Buffered"):
        try:  # deeper pipelining on v7x only (DMA-dominated steps)
            data_spec = pl.BlockSpec((tile_b, tile_d), data_map,
                                     pipeline_mode=pl.Buffered(3))
        except TypeError:
            data_spec = pl.BlockSpec((tile_b, tile_d), data_map)
    w_spec = pl.BlockSpec((tile_b, 1), w_map)

    kernel = functools.partial(
        _wmse_kernel, tile_b=tile_b, num_d_tiles=num_d_tiles, total_b=B,
        inv_n=inv_n, need_mask=need_mask)

    w_itemsize = jnp.dtype(weights.dtype).itemsize
    cost = pl.CostEstimate(
        flops=int(3 * B * D),
        transcendentals=0,
        bytes_accessed=int(2 * B * D * itemsize + B * w_itemsize + 4 * num_cores))

    partials = pl.pallas_call(
        kernel,
        out_shape=jax.ShapeDtypeStruct((num_cores, 1), jnp.float32),
        grid_spec=pltpu.PrefetchScalarGridSpec(
            num_scalar_prefetch=0,
            grid=(num_cores, steps),
            in_specs=[w_spec, data_spec, data_spec],
            out_specs=pl.BlockSpec((1, 1), lambda c, t: (c, 0),
                                   memory_space=pltpu.MemorySpace.SMEM),
            scratch_shapes=[pltpu.VMEM((1, 1), jnp.float32)],
        ),
        compiler_params=pltpu.CompilerParams(
            dimension_semantics=("parallel", "arbitrary")),
        cost_estimate=cost,
    )(weights.reshape(B, 1), y_pred, y_true)

    return jnp.sum(partials)


if __name__ == "__main__":
    key = jax.random.PRNGKey(0)
    k1, k2, k3, k4, k5, k6 = jax.random.split(key, 6)

    def ref_loss(yp, yt, w):
        d = yp.astype(jnp.float32) - yt.astype(jnp.float32)
        return jnp.mean(d * d * w.astype(jnp.float32)[:, None])

    # Case 1: small shapes consistent with the module (B, D) + (B,) weights;
    # single-tile grid path.
    B, D = 16, 256
    y_pred = jax.random.normal(k1, (B, D), dtype=jnp.float32)
    y_true = jax.random.normal(k2, (B, D), dtype=jnp.float32)
    weights = jax.random.uniform(k3, (B,), dtype=jnp.float32,
                                 minval=0.5, maxval=1.5)
    loss = jax.block_until_ready(weighted_mse_loss(y_pred, y_true, weights))
    ref = ref_loss(y_pred, y_true, weights)
    assert jnp.allclose(loss, ref, rtol=1e-5, atol=1e-6), (loss, ref)

    # Case 2: multi-tile grid + ragged batch tail (exercises row masking).
    B2, D2 = 40, 128
    yp2 = jax.random.normal(k4, (B2, D2), dtype=jnp.float32)
    yt2 = jax.random.normal(k5, (B2, D2), dtype=jnp.float32)
    w2 = jax.random.uniform(k6, (B2,), dtype=jnp.float32,
                            minval=0.5, maxval=1.5)
    loss2 = jax.block_until_ready(weighted_mse_loss(yp2, yt2, w2, tile_b=16))
    ref2 = ref_loss(yp2, yt2, w2)
    assert jnp.allclose(loss2, ref2, rtol=1e-5, atol=1e-6), (loss2, ref2)

    # Case 3: even tile count -> 2-way core grid split; bf16 inputs upcast
    # inside the kernel.
    B3, D3 = 64, 128
    ka, kb, kc = jax.random.split(k1, 3)
    yp3 = jax.random.normal(ka, (B3, D3), dtype=jnp.bfloat16)
    yt3 = jax.random.normal(kb, (B3, D3), dtype=jnp.bfloat16)
    w3 = jax.random.uniform(kc, (B3,), dtype=jnp.float32,
                            minval=0.5, maxval=1.5)
    loss3 = jax.block_until_ready(weighted_mse_loss(yp3, yt3, w3, tile_b=16))
    ref3 = ref_loss(yp3, yt3, w3)
    assert jnp.allclose(loss3, ref3, rtol=1e-3, atol=1e-4), (loss3, ref3)

    print("KERNEL_OK")
</pallas_src>

<mosaic_0001>
module attributes {stable_mosaic.version = 11 : i64} {
  func.func @_wmse_kernel(%arg0: i32, %arg1: i32, %arg2: memref<16x1xf32, #tpu.memory_space<vmem>>, %arg3: memref<16x256xf32, #tpu.memory_space<vmem>>, %arg4: memref<16x256xf32, #tpu.memory_space<vmem>>, %arg5: memref<1x1xf32, #tpu.memory_space<smem>>, %arg6: memref<1x1xf32, #tpu.memory_space<vmem>>) attributes {dimension_semantics = [#tpu.dimension_semantics<parallel>, #tpu.dimension_semantics<arbitrary>], iteration_bounds = array<i64: 1, 1>, scalar_prefetch = 0 : i64, scratch_operands = 1 : i64, tpu.core_type = #tpu.core_type<tc>, window_params = [{transform_indices = @transform_0, window_bounds = array<i64: 16, 1>}, {transform_indices = @transform_1, window_bounds = array<i64: 16, 256>}, {transform_indices = @transform_2, window_bounds = array<i64: 16, 256>}, {transform_indices = @transform_3, window_bounds = array<i64: 1, 1>}]} {
    %c0_i32 = arith.constant 0 : i32
    %0 = arith.cmpi eq, %arg1, %c0_i32 : i32
    %1 = arith.extui %0 : i1 to i32
    %c0_i32_0 = arith.constant 0 : i32
    %2 = arith.cmpi ne, %1, %c0_i32_0 : i32
    scf.if %2 {
      %cst_13 = arith.constant 0.000000e+00 : f32
      %19 = vector.broadcast %cst_13 : f32 to vector<1x1xf32>
      %c0_14 = arith.constant 0 : index
      %c0_15 = arith.constant 0 : index
      %20 = vector.load %arg6[%c0_14, %c0_15] : memref<1x1xf32, #tpu.memory_space<vmem>>, vector<1x1xf32>
      tpu.vector_store %arg6[%c0_14, %c0_15], %19 {strides = array<i32>} : memref<1x1xf32, #tpu.memory_space<vmem>>, vector<1x1xf32>,
    } else {
    }
    %c0 = arith.constant 0 : index
    %c0_1 = arith.constant 0 : index
    %3 = vector.load %arg3[%c0, %c0_1] : memref<16x256xf32, #tpu.memory_space<vmem>>, vector<16x256xf32>
    %c0_2 = arith.constant 0 : index
    %c0_3 = arith.constant 0 : index
    %4 = vector.load %arg4[%c0_2, %c0_3] : memref<16x256xf32, #tpu.memory_space<vmem>>, vector<16x256xf32>
    %5 = arith.subf %3, %4 : vector<16x256xf32>
    %6 = arith.mulf %5, %5 : vector<16x256xf32>
    %cst = arith.constant dense<0.000000e+00> : vector<16xf32>
    %7 = vector.multi_reduction <add>, %6, %cst [1] : vector<16x256xf32> to vector<16xf32>
    %8 = vector.shape_cast %7 : vector<16xf32> to vector<16x1xf32>
    %c0_4 = arith.constant 0 : index
    %c0_5 = arith.constant 0 : index
    %9 = vector.load %arg2[%c0_4, %c0_5] : memref<16x1xf32, #tpu.memory_space<vmem>>, vector<16x1xf32>
    %10 = arith.mulf %8, %9 : vector<16x1xf32>
    %c0_6 = arith.constant 0 : index
    %c0_7 = arith.constant 0 : index
    %11 = vector.load %arg6[%c0_6, %c0_7] : memref<1x1xf32, #tpu.memory_space<vmem>>, vector<1x1xf32>
    %cst_8 = arith.constant dense<0.000000e+00> : vector<1xf32>
    %12 = vector.multi_reduction <add>, %10, %cst_8 [0] : vector<16x1xf32> to vector<1xf32>
    %13 = vector.shape_cast %12 : vector<1xf32> to vector<1x1xf32>
    %14 = arith.addf %11, %13 : vector<1x1xf32>
    %c0_9 = arith.constant 0 : index
    %c0_10 = arith.constant 0 : index
    %15 = vector.load %arg6[%c0_9, %c0_10] : memref<1x1xf32, #tpu.memory_space<vmem>>, vector<1x1xf32>
    tpu.vector_store %arg6[%c0_9, %c0_10], %14 {strides = array<i32>} : memref<1x1xf32, #tpu.memory_space<vmem>>, vector<1x1xf32>,
    %c0_i32_11 = arith.constant 0 : i32
    %16 = arith.cmpi eq, %arg1, %c0_i32_11 : i32
    %17 = arith.extui %16 : i1 to i32
    %c0_i32_12 = arith.constant 0 : i32
    %18 = arith.cmpi ne, %17, %c0_i32_12 : i32
    scf.if %18 {
      %c0_13 = arith.constant 0 : index
      %c0_14 = arith.constant 0 : index
      %19 = vector.load %arg6[%c0_13, %c0_14] : memref<1x1xf32, #tpu.memory_space<vmem>>, vector<1x1xf32>
      %20 = vector.shape_cast %19 : vector<1x1xf32> to vector<1x1x1xf32>
      %cst_15 = arith.constant dense<0.000000e+00> : vector<1xf32>
      %21 = vector.multi_reduction <add>, %20, %cst_15 [1, 2] : vector<1x1x1xf32> to vector<1xf32>
      %22 = vector.shape_cast %21 : vector<1xf32> to vector<1x1x1xf32>
      %23 = vector.extract %22[0, 0, 0] : f32 from vector<1x1x1xf32>
      %cst_16 = arith.constant 2.44140625E-4 : f32
      %24 = arith.mulf %23, %cst_16 : f32
      %c0_17 = arith.constant 0 : index
      %c0_18 = arith.constant 0 : index
      %25 = memref.load %arg5[%c0_17, %c0_18] : memref<1x1xf32, #tpu.memory_space<smem>>
      memref.store %24, %arg5[%c0_17, %c0_18] : memref<1x1xf32, #tpu.memory_space<smem>>
    } else {
    }
    return
  }
  func.func @transform_0(%arg0: i32, %arg1: i32) -> (i32, i32) {
    %c1_i32 = arith.constant 1 : i32
    %0 = arith.muli %arg0, %c1_i32 : i32
    %1 = arith.addi %0, %arg1 : i32
    %c0_i32 = arith.constant 0 : i32
    %2 = arith.minsi %1, %c0_i32 : i32
    %c0_i32_0 = arith.constant 0 : i32
    %c0_i32_1 = arith.constant 0 : i32
    return %2, %c0_i32_0 : i32, i32
  }
  func.func @transform_1(%arg0: i32, %arg1: i32) -> (i32, i32) {
    %c1_i32 = arith.constant 1 : i32
    %0 = arith.muli %arg0, %c1_i32 : i32
    %1 = arith.addi %0, %arg1 : i32
    %c0_i32 = arith.constant 0 : i32
    %2 = arith.minsi %1, %c0_i32 : i32
    %c0_i32_0 = arith.constant 0 : i32
    %c0_i32_1 = arith.constant 0 : i32
    return %2, %c0_i32_0 : i32, i32
  }
  func.func @transform_2(%arg0: i32, %arg1: i32) -> (i32, i32) {
    %c1_i32 = arith.constant 1 : i32
    %0 = arith.muli %arg0, %c1_i32 : i32
    %1 = arith.addi %0, %arg1 : i32
    %c0_i32 = arith.constant 0 : i32
    %2 = arith.minsi %1, %c0_i32 : i32
    %c0_i32_0 = arith.constant 0 : i32
    %c0_i32_1 = arith.constant 0 : i32
    return %2, %c0_i32_0 : i32, i32
  }
  func.func @transform_3(%arg0: i32, %arg1: i32) -> (i32, i32) {
    %c0_i32 = arith.constant 0 : i32
    %c0_i32_0 = arith.constant 0 : i32
    return %arg0, %c0_i32 : i32, i32
  }
}

</mosaic_0001>

<bundles_post_ra>
// kernel: tpu_custom_call.1
= control target key start
LH: loop header
LB: loop body
LE: loop exit
PB: predicated region body
PF: predicated region fallthrough
CT: control target
= control target key end

     0   :  { %8 = vsyncpa [#allocation4], 0  ;;  %s282_s0 = inlined_call_operand.vmem [shape: f32[16,1], index: 0, kind: input, shape index: {}]   ;;  %s283_s1 = inlined_call_operand.hbm [shape: f32[16,256], index: 1, kind: input, shape index: {}]   ;;  %s284_s2 = inlined_call_operand.hbm [shape: f32[16,256], index: 2, kind: input, shape index: {}]   ;;  %s285_s3 = inlined_call_operand.hbm [shape: f32[1,1], index: 3, kind: output, shape index: {}]  }
   0x1   :  { %9 = vsyncpa [#allocation7], 0 }
   0x2   :  { %10 = vsyncpa [#allocation5], 0  ;;  %s239_s12 = smov [#allocation3]  }
   0x3   :  { %s37_s13 = sshll.u32 %s239_s12, 4  ;;  %s38_s13 = int_to_ptr.vmem [resolvable:$true] %s37_s13 }
   0x4   :  { %s193_s14 = scalar_lea.vmem %s38_s13, 512  ;;  %p198_p1 = scmp.lt.s32.totalorder %s38_s13, %s38_s13 }
   0x5   :  { %p194_p0 = scmp.ne.s32.totalorder %s38_s13, %s193_s14  ;;  %p199_p2 = scmp.lt.s32.totalorder %s193_s14, %s193_s14 }
   0x7   :  { %p200_p3 = por %p199_p2, %p198_p1 }
   0x9   :  { %p201_p4 = pnand %p200_p3, %p194_p0 }
   0xb   :  { %204 = shalt.err (!%p201_p4)
}
   0xc   :  { %s240_s15 = smov 256   ;;  %s241_s16 = smov 16  }
   0xd   :  { %43 = dma.hbm_to_vmem [thread:$0]  %s283_s1, 512, %s38_s13, [#allocation4], %s240_s15, %s240_s15, %s241_s16  }
   0xe   :  { %s242_s19 = smov [#allocation6]  }
   0xf   :  { %s56_s20 = sshll.u32 %s242_s19, 4  ;;  %s57_s20 = int_to_ptr.vmem [resolvable:$true] %s56_s20 }
  0x10   :  { %s213_s21 = scalar_lea.vmem %s57_s20, 512  ;;  %p218_p6 = scmp.lt.s32.totalorder %s57_s20, %s57_s20 }
  0x11   :  { %p214_p5 = scmp.ne.s32.totalorder %s57_s20, %s213_s21  ;;  %p219_p7 = scmp.lt.s32.totalorder %s213_s21, %s213_s21 }
  0x13   :  { %p220_p8 = por %p219_p7, %p218_p6 }
  0x15   :  { %p221_p9 = pnand %p220_p8, %p214_p5 }
  0x17   :  { %224 = shalt.err (!%p221_p9)
}
  0x18   :  { %62 = dma.hbm_to_vmem [thread:$0]  %s284_s2, 512, %s57_s20, [#allocation7], %s240_s15, %s240_s15, %s241_s16  }
  0x19   :  { %233 = dma.done.wait [#allocation4], 512  }
  0x1a   :  { %234 = vsyncadd [#allocation4], 4294966784 }
  0x1b   :  { %235 = dma.done.wait [#allocation7], 512  }
  0x1c   :  { %236 = vsyncadd [#allocation7], 4294966784  ;;  %v103_v0 = vld [vmem:[#allocation3] sm:$0xff]  ;;  %v104_v1 = vld [vmem:[#allocation3 + $0x8] sm:$0xff]  ;;  %vm101_vm0 = vcmask 0   ;;  %v243_v18 = vmov 0.0  }
  0x1d   :  { %v107_v2 = vld [vmem:[#allocation6] sm:$0xff]  ;;  %v108_v3 = vld [vmem:[#allocation6 + $0x8] sm:$0xff]  ;;  %v105_v5 = vld [vmem:[#allocation3 + $0x10] sm:$0xff]  ;;  %102 = vst.msk [vmem:[#allocation2] sm:$0x1] %vm101_vm0, %v243_v18  ;;  %vm130_vm1 = vcmask 7168  }
  0x1e   :  { %v111_v4 = vsub.f32 %v103_v0, %v107_v2  ;;  %v106_v6 = vld [vmem:[#allocation3 + $0x18] sm:$0xff]  ;;  %v112_v7 = vsub.f32 %v104_v1, %v108_v3  ;;  %v109_v8 = vld [vmem:[#allocation6 + $0x10] sm:$0xff]  ;;  %v126_v21 = vld [vmem:[%s282_s0 + $0x8] sm:$0xff]  ;;  %s244_s27 = smov [#allocation8]  }
  0x1f   :  { %v110_v9 = vld [vmem:[#allocation6 + $0x18] sm:$0xff]  ;;  %v113_v11 = vsub.f32 %v105_v5, %v109_v8 }
  0x20   :  { %v115_v10 = vmul.f32 %v111_v4, %v111_v4  ;;  %v114_v12 = vsub.f32 %v106_v6, %v110_v9  ;;  %v116_v13 = vmul.f32 %v112_v7, %v112_v7  ;;  %v125_v19 = vld [vmem:[%s282_s0] sm:$0xff] }
  0x21   :  { %v117_v14 = vmul.f32 %v113_v11, %v113_v11 }
  0x22   :  { %v118_v15 = vmul.f32 %v114_v12, %v114_v12  ;;  %v119_v16 = vadd.f32 %v116_v13, %v115_v10 }
  0x24   :  { %120 = vadd.xlane.f32.xlu0 %v119_v16  ;;  %v122_v17 = vadd.f32 %v118_v15, %v117_v14  ;;  %v129_v33 = vld [vmem:[#allocation2] sm:$0x1] }
  0x28   :  { %123 = vadd.xlane.f32.xlu0 %v122_v17 }
  0xad   :  { %v121_v20 = vpop.xlane.xlu0 %120 }
  0xae   :  { %v127_v22 = vmul.f32 %v125_v19, %v121_v20 }
  0xb0   :  { %v131_v25 = vsel %vm130_vm1, %v127_v22, 0.0 }
  0xb1   :  { %v124_v23 = vpop.xlane.xlu0 %123 }
  0xb2   :  { %v128_v24 = vmul.f32 %v126_v21, %v124_v23 }
  0xb4   :  { %v132_v26 = vsel %vm130_vm1, %v128_v24, 0.0 }
  0xb5   :  { %v133_v27 = vadd.f32 %v132_v26, %v131_v25 }
  0xb7   :  { %v134_v28 = vrot.slane %v133_v27, 4 }
  0xb9   :  { %v135_v29 = vadd.f32 %v134_v28, %v133_v27 }
  0xbb   :  { %v136_v30 = vrot.slane %v135_v29, 2 }
  0xbd   :  { %v137_v31 = vadd.f32 %v136_v30, %v135_v29 }
  0xbf   :  { %v138_v32 = vrot.slane %v137_v31, 1 }
  0xc1   :  { %v139_v34 = vadd.f32 %v138_v32, %v137_v31 }
  0xc3   :  { %v140_v35 = vadd.f32 %v139_v34, %v129_v33 }
  0xc5   :  { %142 = vst.msk [vmem:[#allocation2] sm:$0x1] %vm101_vm0, %v140_v35 }
  0xcc   :  { %v146_v36 = vld [vmem:[#allocation2] sm:$0x1] }
  0xcd   :  { %177 = vpush %v146_v36 }
  0xfe   :  { %s178_s0 = spop %177 }
  0xff   :  { %s149_s26 = smul.f32 0.00024414063, %s178_s0 }
 0x101   :  { %151 = sst [smem:[#allocation8]] %s149_s26 }
 0x102   :  { %159 = dma.smem_to_hbm %s244_s27, 16, %s285_s3, [#allocation5]  }
 0x103   :  { %237 = dma.done.wait [#allocation5], 16  }
 0x104   :  { %238 = vsyncadd [#allocation5], 4294967280 }
 0x105   :  { %163 = sfence }
 0x106   :  { %164 = vsyncpa [#allocation4], 1 }
 0x107   :  { %165 = vsyncpa [#allocation7], 1 }
 0x108   :  { %166 = vsyncpa [#allocation5], 1 }

</bundles_post_ra>
